<compile_context>
chip_gen: v7x
topology: tpu7x:2x2x1
jax: 0.10.0
libtpu: 0.0.40
codegen_flags: <defaults>
</compile_context>

<pallas_src>
import functools

import jax
import jax.numpy as jnp
from jax.experimental import pallas as pl
from jax.experimental.pallas import tpu as pltpu


_ACTIVATIONS = {
    "relu": lambda h: jnp.maximum(h, 0.0),
    "tanh": jnp.tanh,
    "sigmoid": jax.nn.sigmoid,
    "gelu": jax.nn.gelu,
}


def _round_up(x, m):
    return ((x + m - 1) // m) * m


def _make_fcnet_kernel(num_layers, activation_fn, compute_dtype):
    """Builds kernel(x_ref, w0_ref, ..., w{L-1}_ref, out_ref).

    Weights arrive pre-transposed as (in_i, out_i), so each layer is a plain
    (M,K)x(K,N) jnp.dot straight onto the MXU with an f32 accumulator.
    """

    def kernel(x_ref, *refs):
        w_refs = refs[:num_layers]
        out_ref = refs[num_layers]

        h = x_ref[...]  # already compute_dtype (cast once in the wrapper)
        for i in range(num_layers):
            lhs = h if h.dtype == compute_dtype else h.astype(compute_dtype)
            h = jnp.dot(lhs, w_refs[i][...],
                        preferred_element_type=jnp.float32)
            if i < num_layers - 1:
                h = activation_fn(h)  # activation / accumulator stay f32
        out_ref[...] = h.astype(out_ref.dtype)

    return kernel


@functools.partial(jax.jit, static_argnames=("activation", "use_bf16", "tile_m"))
def fcnet_forward(x, weights, activation="relu", use_bf16=False, tile_m=512):
    """Fused FCNet forward.

    x:       (B, 2**D) float array.
    weights: list of D arrays in PyTorch nn.Linear layout (out_i, in_i).
    """
    act = _ACTIVATIONS[activation]
    num_layers = len(weights)
    batch, in_dim = x.shape
    out_dim = weights[-1].shape[0]

    compute_dtype = jnp.bfloat16 if use_bf16 else jnp.float32
    itemsize = 2 if use_bf16 else 4

    # ---- batch tiling (sublane axis must be a multiple of 8) -----------------
    # Cap the double-buffered x tile at ~16 MiB of VMEM so very wide inputs
    # still pipeline, and never over-pad tiny batches.
    vmem_cap_rows = max(8, ((16 * 2 ** 20) // (2 * in_dim * itemsize)) // 8 * 8)
    tm = min(tile_m, vmem_cap_rows, _round_up(batch, 8))
    grid_m = pl.cdiv(batch, tm)
    padded_b = grid_m * tm

    # ---- one-time wrapper-side prep (outside the grid loop) ------------------
    # Cast once (halves HBM traffic for bf16) and pad the batch if needed.
    x_in = x.astype(compute_dtype)
    if padded_b != batch:
        x_in = jnp.pad(x_in, ((0, padded_b - batch), (0, 0)))
    # Pre-transpose weights to (in, out): canonical MXU layout, no in-kernel
    # transposed-RHS handling. This is a tiny one-shot XLA op on the weights.
    ws = tuple(jnp.transpose(w).astype(compute_dtype) for w in weights)

    kernel = _make_fcnet_kernel(num_layers, act, compute_dtype)

    # x / out tiled over batch; weights use a constant index_map so each is
    # DMA'd once and stays VMEM-resident across all grid steps.
    in_specs = [pl.BlockSpec((tm, in_dim), lambda i: (i, 0))] + [
        pl.BlockSpec(w.shape, lambda i: (0, 0)) for w in ws
    ]
    out_spec = pl.BlockSpec((tm, out_dim), lambda i: (i, 0))

    # Advisory cost estimate for XLA's scheduler.
    flops = 2 * padded_b * sum(w.shape[0] * w.shape[1] for w in ws)
    transcendentals = (padded_b * sum(w.shape[1] for w in ws[:-1])
                       if activation in ("tanh", "sigmoid", "gelu") else 0)
    bytes_accessed = (padded_b * in_dim * itemsize
                      + sum(w.size for w in ws) * itemsize
                      + padded_b * out_dim * 4)

    # VMEM budget: double-buffered x/out tiles, (conservatively double-counted)
    # resident weights, plus f32 intermediate activations (geometric series
    # sums to ~tm*in_dim elements), with 2x headroom; capped at the v7x-class
    # 64 MiB physical VMEM.
    weight_bytes = sum(w.size for w in ws) * itemsize
    tile_bytes = 2 * tm * in_dim * itemsize + 2 * tm * out_dim * 4
    inter_bytes = tm * in_dim * 4
    vmem_limit = int(min(64 * 2 ** 20,
                         max(32 * 2 ** 20,
                             2 * (2 * weight_bytes + tile_bytes + inter_bytes))))
    # TODO(synk): for tree_depth >~ 12 the largest early-layer weights no longer
    # fit VMEM (first on v7x, 64 MiB); they should be streamed from HBM via a K
    # grid axis (or BlockSpec(memory_space=pl.ANY) + manual DMA) instead of
    # being held fully resident.

    out = pl.pallas_call(
        kernel,
        out_shape=jax.ShapeDtypeStruct((padded_b, out_dim), jnp.float32),
        grid=(grid_m,),
        in_specs=in_specs,
        out_specs=out_spec,
        compiler_params=pltpu.CompilerParams(
            dimension_semantics=("parallel",),  # 2-TC sharding on v7x
            vmem_limit_bytes=vmem_limit),
        cost_estimate=pl.CostEstimate(
            flops=int(flops),
            transcendentals=int(transcendentals),
            bytes_accessed=int(bytes_accessed)),
    )(x_in, *ws)

    return out[:batch]


def init_fcnet_params(key, tree_depth):
    """Deterministic init mimicking nn.Linear default: U(-1/sqrt(in), 1/sqrt(in))."""
    weights = []
    for i in range(tree_depth):
        in_dim = 2 ** (tree_depth - i)
        out_dim = 2 ** (tree_depth - i - 1)
        key, sub = jax.random.split(key)
        bound = 1.0 / (in_dim ** 0.5)
        w = jax.random.uniform(sub, (out_dim, in_dim), jnp.float32,
                               minval=-bound, maxval=bound)
        weights.append(w)
    return weights


def fcnet_reference(x, weights, activation="relu"):
    act = _ACTIVATIONS[activation]
    h = x
    for w in weights[:-1]:
        h = act(h @ w.T)
    return h @ weights[-1].T


if __name__ == "__main__":
    tree_depth = 5            # features: 32 -> 16 -> 8 -> 4 -> 2 -> 1
    activation = "relu"

    key = jax.random.PRNGKey(0)
    kx, kw = jax.random.split(key)
    weights = init_fcnet_params(kw, tree_depth)

    # --- small batch, f32 path (tight tolerance) ---
    batch = 8
    x = jax.random.normal(kx, (batch, 2 ** tree_depth), jnp.float32)
    out = jax.block_until_ready(fcnet_forward(x, weights, activation=activation))
    ref = fcnet_reference(x, weights, activation=activation)
    assert out.shape == (batch, 1), out.shape
    assert jnp.allclose(out, ref, atol=1e-5, rtol=1e-5), "f32 mismatch vs reference"

    # --- batch not a multiple of the tile: exercises padding / tile clamp ---
    batch2 = 300
    x2 = jax.random.normal(jax.random.PRNGKey(1), (batch2, 2 ** tree_depth),
                           jnp.float32)
    out2 = jax.block_until_ready(fcnet_forward(x2, weights, activation=activation))
    ref2 = fcnet_reference(x2, weights, activation=activation)
    assert out2.shape == (batch2, 1), out2.shape
    assert jnp.allclose(out2, ref2, atol=1e-5, rtol=1e-5), "grid/pad mismatch"

    # --- multi-step grid path (batch > tile_m) ---
    batch3 = 1024 + 40
    x3 = jax.random.normal(jax.random.PRNGKey(2), (batch3, 2 ** tree_depth),
                           jnp.float32)
    out3 = jax.block_until_ready(
        fcnet_forward(x3, weights, activation=activation, tile_m=256))
    ref3 = fcnet_reference(x3, weights, activation=activation)
    assert out3.shape == (batch3, 1), out3.shape
    assert jnp.allclose(out3, ref3, atol=1e-5, rtol=1e-5), "multi-tile mismatch"

    # --- tanh activation (exercises EUP path) ---
    out_t = jax.block_until_ready(fcnet_forward(x2, weights, activation="tanh"))
    ref_t = fcnet_reference(x2, weights, activation="tanh")
    assert jnp.allclose(out_t, ref_t, atol=1e-5, rtol=1e-5), "tanh mismatch"

    # --- bf16 MXU operands, f32 accumulation/activation (looser tolerance) ---
    out_bf16 = jax.block_until_ready(
        fcnet_forward(x2, weights, activation=activation, use_bf16=True))
    assert out_bf16.shape == (batch2, 1), out_bf16.shape
    assert jnp.allclose(out_bf16, ref2, atol=5e-2, rtol=5e-2), "bf16 mismatch"

    print("KERNEL_OK")
</pallas_src>

<mosaic_0001>
module attributes {stable_mosaic.version = 11 : i64} {
  func.func @kernel(%arg0: i32, %arg1: memref<8x32xf32, #tpu.memory_space<vmem>>, %arg2: memref<32x16xf32, #tpu.memory_space<vmem>>, %arg3: memref<16x8xf32, #tpu.memory_space<vmem>>, %arg4: memref<8x4xf32, #tpu.memory_space<vmem>>, %arg5: memref<4x2xf32, #tpu.memory_space<vmem>>, %arg6: memref<2x1xf32, #tpu.memory_space<vmem>>, %arg7: memref<8x1xf32, #tpu.memory_space<vmem>>) attributes {dimension_semantics = [#tpu.dimension_semantics<parallel>], iteration_bounds = array<i64: 1>, scalar_prefetch = 0 : i64, scratch_operands = 0 : i64, tpu.core_type = #tpu.core_type<tc>, window_params = [{transform_indices = @transform_0, window_bounds = array<i64: 8, 32>}, {pipeline_mode = #tpu.pipeline_mode<synchronous>, transform_indices = @transform_1, window_bounds = array<i64: 32, 16>}, {pipeline_mode = #tpu.pipeline_mode<synchronous>, transform_indices = @transform_2, window_bounds = array<i64: 16, 8>}, {pipeline_mode = #tpu.pipeline_mode<synchronous>, transform_indices = @transform_3, window_bounds = array<i64: 8, 4>}, {pipeline_mode = #tpu.pipeline_mode<synchronous>, transform_indices = @transform_4, window_bounds = array<i64: 4, 2>}, {pipeline_mode = #tpu.pipeline_mode<synchronous>, transform_indices = @transform_5, window_bounds = array<i64: 2, 1>}, {transform_indices = @transform_6, window_bounds = array<i64: 8, 1>}]} {
    %c0 = arith.constant 0 : index
    %c0_0 = arith.constant 0 : index
    %0 = vector.load %arg1[%c0, %c0_0] : memref<8x32xf32, #tpu.memory_space<vmem>>, vector<8x32xf32>
    %c0_1 = arith.constant 0 : index
    %c0_2 = arith.constant 0 : index
    %1 = vector.load %arg2[%c0_1, %c0_2] : memref<32x16xf32, #tpu.memory_space<vmem>>, vector<32x16xf32>
    %cst = arith.constant dense<0.000000e+00> : vector<8x16xf32>
    %2 = tpu.matmul %0, %1, %cst {dimension_numbers = #tpu.dot_dimension_numbers<[1], [0], [0], [1], [0, 0, 1, 1], [], []>} : vector<8x32xf32>, vector<32x16xf32>, vector<8x16xf32> -> vector<8x16xf32>
    %cst_3 = arith.constant 0.000000e+00 : f32
    %3 = vector.broadcast %cst_3 : f32 to vector<8x16xf32>
    %4 = arith.maximumf %2, %3 : vector<8x16xf32>
    %c0_4 = arith.constant 0 : index
    %c0_5 = arith.constant 0 : index
    %5 = vector.load %arg3[%c0_4, %c0_5] : memref<16x8xf32, #tpu.memory_space<vmem>>, vector<16x8xf32>
    %cst_6 = arith.constant dense<0.000000e+00> : vector<8x8xf32>
    %6 = tpu.matmul %4, %5, %cst_6 {dimension_numbers = #tpu.dot_dimension_numbers<[1], [0], [0], [1], [0, 0, 1, 1], [], []>} : vector<8x16xf32>, vector<16x8xf32>, vector<8x8xf32> -> vector<8x8xf32>
    %cst_7 = arith.constant 0.000000e+00 : f32
    %7 = vector.broadcast %cst_7 : f32 to vector<8x8xf32>
    %8 = arith.maximumf %6, %7 : vector<8x8xf32>
    %c0_8 = arith.constant 0 : index
    %c0_9 = arith.constant 0 : index
    %9 = vector.load %arg4[%c0_8, %c0_9] : memref<8x4xf32, #tpu.memory_space<vmem>>, vector<8x4xf32>
    %cst_10 = arith.constant dense<0.000000e+00> : vector<8x4xf32>
    %10 = tpu.matmul %8, %9, %cst_10 {dimension_numbers = #tpu.dot_dimension_numbers<[1], [0], [0], [1], [0, 0, 1, 1], [], []>} : vector<8x8xf32>, vector<8x4xf32>, vector<8x4xf32> -> vector<8x4xf32>
    %cst_11 = arith.constant 0.000000e+00 : f32
    %11 = vector.broadcast %cst_11 : f32 to vector<8x4xf32>
    %12 = arith.maximumf %10, %11 : vector<8x4xf32>
    %c0_12 = arith.constant 0 : index
    %c0_13 = arith.constant 0 : index
    %13 = vector.load %arg5[%c0_12, %c0_13] : memref<4x2xf32, #tpu.memory_space<vmem>>, vector<4x2xf32>
    %cst_14 = arith.constant dense<0.000000e+00> : vector<8x2xf32>
    %14 = tpu.matmul %12, %13, %cst_14 {dimension_numbers = #tpu.dot_dimension_numbers<[1], [0], [0], [1], [0, 0, 1, 1], [], []>} : vector<8x4xf32>, vector<4x2xf32>, vector<8x2xf32> -> vector<8x2xf32>
    %cst_15 = arith.constant 0.000000e+00 : f32
    %15 = vector.broadcast %cst_15 : f32 to vector<8x2xf32>
    %16 = arith.maximumf %14, %15 : vector<8x2xf32>
    %c0_16 = arith.constant 0 : index
    %c0_17 = arith.constant 0 : index
    %17 = vector.load %arg6[%c0_16, %c0_17] : memref<2x1xf32, #tpu.memory_space<vmem>>, vector<2x1xf32>
    %cst_18 = arith.constant dense<0.000000e+00> : vector<8x1xf32>
    %18 = tpu.matmul %16, %17, %cst_18 {dimension_numbers = #tpu.dot_dimension_numbers<[1], [0], [0], [1], [0, 0, 1, 1], [], []>} : vector<8x2xf32>, vector<2x1xf32>, vector<8x1xf32> -> vector<8x1xf32>
    %c0_19 = arith.constant 0 : index
    %c0_20 = arith.constant 0 : index
    %19 = vector.load %arg7[%c0_19, %c0_20] : memref<8x1xf32, #tpu.memory_space<vmem>>, vector<8x1xf32>
    tpu.vector_store %arg7[%c0_19, %c0_20], %18 {strides = array<i32>} : memref<8x1xf32, #tpu.memory_space<vmem>>, vector<8x1xf32>,
    return
  }
  func.func @transform_0(%arg0: i32) -> (i32, i32) {
    %c0_i32 = arith.constant 0 : i32
    %c0_i32_0 = arith.constant 0 : i32
    return %arg0, %c0_i32 : i32, i32
  }
  func.func @transform_1(%arg0: i32) -> (i32, i32) {
    %c0_i32 = arith.constant 0 : i32
    %c0_i32_0 = arith.constant 0 : i32
    %c0_i32_1 = arith.constant 0 : i32
    return %c0_i32, %c0_i32_0 : i32, i32
  }
  func.func @transform_2(%arg0: i32) -> (i32, i32) {
    %c0_i32 = arith.constant 0 : i32
    %c0_i32_0 = arith.constant 0 : i32
    %c0_i32_1 = arith.constant 0 : i32
    return %c0_i32, %c0_i32_0 : i32, i32
  }
  func.func @transform_3(%arg0: i32) -> (i32, i32) {
    %c0_i32 = arith.constant 0 : i32
    %c0_i32_0 = arith.constant 0 : i32
    %c0_i32_1 = arith.constant 0 : i32
    return %c0_i32, %c0_i32_0 : i32, i32
  }
  func.func @transform_4(%arg0: i32) -> (i32, i32) {
    %c0_i32 = arith.constant 0 : i32
    %c0_i32_0 = arith.constant 0 : i32
    %c0_i32_1 = arith.constant 0 : i32
    return %c0_i32, %c0_i32_0 : i32, i32
  }
  func.func @transform_5(%arg0: i32) -> (i32, i32) {
    %c0_i32 = arith.constant 0 : i32
    %c0_i32_0 = arith.constant 0 : i32
    %c0_i32_1 = arith.constant 0 : i32
    return %c0_i32, %c0_i32_0 : i32, i32
  }
  func.func @transform_6(%arg0: i32) -> (i32, i32) {
    %c0_i32 = arith.constant 0 : i32
    %c0_i32_0 = arith.constant 0 : i32
    return %arg0, %c0_i32 : i32, i32
  }
}

</mosaic_0001>

<bundles_post_ra>
// kernel: fcnet_forward.1
= control target key start
LH: loop header
LB: loop body
LE: loop exit
PB: predicated region body
PF: predicated region fallthrough
CT: control target
= control target key end

     0   :  { %v487_v0 = vmov 0.0|0.0   ;;  %vm488_vm0 = vmmov 0   ;;  %v489_v4 = vmov 0.0   ;;  %vm28_vm1 = vcmask 261120   ;;  %s563_s1 = inlined_call_operand.vmem [shape: f32[32,16], index: 1, kind: input, shape index: {}]   ;;  %s564_s0 = inlined_call_operand.vmem [shape: f32[8,32], index: 0, kind: input, shape index: {}]   ;;  %s565_s2 = inlined_call_operand.vmem [shape: f32[16,8], index: 2, kind: input, shape index: {}]   ;;  %s566_s3 = inlined_call_operand.vmem [shape: f32[8,4], index: 3, kind: input, shape index: {}]   ;;  %s567_s4 = inlined_call_operand.vmem [shape: f32[4,2], index: 4, kind: input, shape index: {}]   ;;  %s568_s5 = inlined_call_operand.vmem [shape: f32[2,1], index: 5, kind: input, shape index: {}]   ;;  %s569_s6 = inlined_call_operand.vmem [shape: f32[8,1], index: 6, kind: output, shape index: {}]  }
   0x1   :  { %475 = vmatprep.subr.bf16.mxu0 %v487_v0  ;;  %v24_v1 = vld [vmem:[%s563_s1] sm:$0xff]  ;;  %v25_v2 = vld [vmem:[%s563_s1 + $0x8] sm:$0xff]  ;;  %v26_v3 = vld [vmem:[%s563_s1 + $0x10] sm:$0xff]  ;;  %450 = vmatprep.mubr.msk.f32.mxu0 %vm488_vm0, %v489_v4  ;;  %vm105_vm2 = vcmask 130048   ;;  %vm261_vm3 = vcmask 1043456   ;;  %vm181_vm4 = vcmask 64512  }
   0x2   :  { %v476_v5 = vpack.c.bf16 %v25_v2, %v24_v1  ;;  %v27_v6 = vld [vmem:[%s563_s1 + $0x18] sm:$0xff]  ;;  %481 = vmatprep.subr.bf16.mxu1 %v487_v0  ;;  %457 = vmatprep.mubr.msk.f32.mxu1 %vm488_vm0, %v489_v4  ;;  %v23_v8 = vld [vmem:[%s564_s0] sm:$0xff]  ;;  %v104_v10 = vld [vmem:[%s565_s2 + $0x8] sm:$0xff]  ;;  %vm341_vm5 = vcmask 1041408   ;;  %vm257_vm6 = vcmask 31744   ;;  %vm337_vm7 = vcmask 15360  }
   0x3   :  { %v479_v7 = vpack.c.bf16 %v27_v6, %v26_v3  ;;  %v103_v9 = vld [vmem:[%s565_s2] sm:$0xff]  ;;  %vm415_vm8 = vcmask 7168  }
   0x4   :  { %477 = vmatpush3.bf16.msra.mxu0 %v476_v5  ;;  %v482_v11 = vpack.c.bf16 %v104_v10, %v103_v9  ;;  %v180_v15 = vld [vmem:[%s566_s3] sm:$0xff] }
   0x5   :  { %478 = vmatprep.subr.bf16.mxu0 %v487_v0  ;;  %v256_v16 = vld [vmem:[%s567_s4] sm:$0xf] }
   0x6   :  { %483 = vmatpush3.bf16.msra.mxu1 %v482_v11  ;;  %v336_v20 = vld [vmem:[%s568_s5] sm:$0x3] }
   0x7   :  { %460 = vmatprep.subr.mxu1 %v489_v4 }
   0x8   :  { %480 = vmatpush3.bf16.msra.mxu0 %v479_v7 }
   0x9   :  { %465 = vmatprep.subr.mxu0 %v489_v4 }
   0xb   :  { %451 = vmatmul.mubr.msk.f32.vlgmr.msra.gmra.mrb[0].mxu0 %vm28_vm1, %v23_v8 }
   0xc   :  { %467 = vmatprep.mubr.msk.f32.mxu0 %vm488_vm0, %v489_v4  ;;  %466 = vmatpush3.msk.msra.mxu0 %vm261_vm3, %v256_v16 }
  0xde   :  { %v98_v12 = vpop.f32.mrb[0].mxu0 }
  0xdf   :  { %v102_v13 = vmax.f32 %v98_v12, 0.0  ;;  %v452_v14 = vpop.f32.mrb[1].mxu0 }
  0xe1   :  { %458 = vmatmul.mubr.msk.f32.vlgmr.msra.gmra.mrb[0].mxu1 %vm105_vm2, %v102_v13 }
  0xe2   :  { %461 = vmatpush3.msra.mxu1 %v180_v15  ;;  %462 = vmatprep.mubr.msk.f32.mxu1 %vm488_vm0, %v489_v4 }
  0xe3   :  { %470 = vmatprep.subr.mxu1 %v489_v4 }
 0x1b4   :  { %v175_v17 = vpop.f32.mrb[0].mxu1 }
 0x1b5   :  { %v179_v18 = vmax.f32 %v175_v17, 0.0  ;;  %v459_v19 = vpop.f32.mrb[1].mxu1 }
 0x1b7   :  { %463 = vmatmul.mubr.msk.f32.vlgmr.msra.gmra.mrb[2].mxu1 %vm181_vm4, %v179_v18 }
 0x1b8   :  { %472 = vmatprep.mubr.msk.f32.mxu1 %vm488_vm0, %v489_v4  ;;  %471 = vmatpush3.msk.msra.mxu1 %vm341_vm5, %v336_v20 }
 0x28a   :  { %v251_v21 = vpop.f32.mrb[2].mxu1 }
 0x28b   :  { %v255_v22 = vmax.f32 %v251_v21, 0.0  ;;  %v464_v23 = vpop.f32.mrb[3].mxu1 }
 0x28d   :  { %468 = vmatmul.mubr.msk.f32.vlgmr.msra.gmra.mrb[2].mxu0 %vm257_vm6, %v255_v22 }
 0x360   :  { %v331_v24 = vpop.f32.mrb[2].mxu0 }
 0x361   :  { %v335_v25 = vmax.f32 %v331_v24, 0.0  ;;  %v469_v26 = vpop.f32.mrb[3].mxu0 }
 0x363   :  { %473 = vmatmul.mubr.msk.f32.vlgmr.msra.gmra.mrb[4].mxu1 %vm337_vm7, %v335_v25 }
 0x436   :  { %v411_v27 = vpop.f32.mrb[4].mxu1 }
 0x437   :  { %416 = vst.msk [vmem:[%s569_s6] sm:$0xff] %vm415_vm8, %v411_v27  ;;  %v474_v28 = vpop.f32.mrb[5].mxu1 }

</bundles_post_ra>
